<compile_context>
chip_gen: v6e
topology: v6e:2x2x1
jax: 0.10.0
libtpu: 0.0.40
codegen_flags: <defaults>
</compile_context>

<pallas_src>
import functools

import jax
import jax.numpy as jnp
from jax.experimental import pallas as pl
from jax.experimental.pallas import tpu as pltpu


def _round_up(x, m):
    return ((x + m - 1) // m) * m


def _skip_linear_kernel(x_ref, w_ref, b_ref, o_ref):
    # x_ref: (TM, Dp) row tile of x     (VMEM, streamed per grid step)
    # w_ref: (Dp, Dp) weight            (VMEM-resident across grid steps)
    # b_ref: (1, Dp)  bias              (VMEM-resident across grid steps)
    # o_ref: (TM, Dp) output row tile
    x = x_ref[...]
    y = jnp.dot(x, w_ref[...], preferred_element_type=jnp.float32)   # MXU
    y = y + b_ref[...].astype(jnp.float32)                           # bias (VPU)
    o_ref[...] = (x.astype(jnp.float32) + y).astype(o_ref.dtype)     # residual add


@functools.partial(jax.jit, static_argnames=("tm",))
def skip_connection_linear(x, w, b, *, tm=512):
    """SkipConnection(Linear): out = x + (x @ w + b).

    x: (B, S, D); w: (D, D); b: (D,). Returns (B, S, D).
    tm: row-tile size (rows of the flattened (B*S, D) view per grid step).
    """
    B, S, D = x.shape
    M = B * S

    # Lane-dense last dim (multiple of 128); sublane/tile-friendly row count.
    Dp = _round_up(max(D, 128), 128)
    tm_eff = min(tm, _round_up(M, 8))       # don't use a tile bigger than the data
    Mp = _round_up(M, tm_eff)               # pad rows so every tile is full

    x2 = x.reshape(M, D)
    # Zero padding keeps the valid region of x @ w + b exact; padded rows/cols
    # are discarded by the final slice.
    x2p = jnp.pad(x2, ((0, Mp - M), (0, Dp - D)))
    wp = jnp.pad(w, ((0, Dp - D), (0, Dp - D)))
    bp = jnp.pad(b, (0, Dp - D)).reshape(1, Dp)

    itemsize = jnp.dtype(x.dtype).itemsize
    cost = pl.CostEstimate(
        flops=2 * Mp * Dp * Dp + 2 * Mp * Dp,                      # matmul + bias/residual
        transcendentals=0,
        bytes_accessed=(2 * Mp * Dp + Dp * Dp + Dp) * itemsize,    # read x, write out, W, b
    )

    out = pl.pallas_call(
        _skip_linear_kernel,
        out_shape=jax.ShapeDtypeStruct((Mp, Dp), x.dtype),
        grid_spec=pltpu.PrefetchScalarGridSpec(
            num_scalar_prefetch=0,
            grid=(Mp // tm_eff,),
            in_specs=[
                pl.BlockSpec((tm_eff, Dp), lambda i: (i, 0)),   # x: streamed row tiles
                pl.BlockSpec((Dp, Dp), lambda i: (0, 0)),       # W: resident
                pl.BlockSpec((1, Dp), lambda i: (0, 0)),        # b: resident
            ],
            out_specs=pl.BlockSpec((tm_eff, Dp), lambda i: (i, 0)),
        ),
        compiler_params=pltpu.CompilerParams(
            dimension_semantics=("parallel",),        # v7x: shard row tiles over 2 TCs
            vmem_limit_bytes=48 * 1024 * 1024,        # headroom under v7x's 64 MiB VMEM
        ),
        cost_estimate=cost,
        input_output_aliases={0: 0},                  # out reuses padded-x HBM buffer
    )(x2p, wp, bp)

    return out[:M, :D].reshape(B, S, D)


if __name__ == "__main__":
    key = jax.random.PRNGKey(0)
    k_x, k_w, k_b = jax.random.split(key, 3)

    # Small shapes consistent with the TSP graph layers: embed_dim = 128
    # (lane-dense), seq = graph size 50, batch = 2.  M = 100 exercises the
    # multi-tile grid and the M-tail padding path with tm=32.
    batch, seq, embed = 2, 50, 128
    x = jax.random.normal(k_x, (batch, seq, embed), dtype=jnp.float32)

    # PyTorch default Linear init range: uniform(-1/sqrt(fan_in), 1/sqrt(fan_in)).
    bound = 1.0 / (embed ** 0.5)
    w = jax.random.uniform(k_w, (embed, embed), jnp.float32, -bound, bound)
    b = jax.random.uniform(k_b, (embed,), jnp.float32, -bound, bound)

    out = skip_connection_linear(x, w, b, tm=32)
    out = jax.block_until_ready(out)

    # Reference check (plain JAX): x + Linear(x)
    ref = x + (jnp.einsum("bsd,de->bse", x, w) + b)
    assert jnp.allclose(out, ref, atol=1e-4, rtol=1e-5), "mismatch vs reference"

    print("KERNEL_OK")
</pallas_src>

<mosaic_0001>
module attributes {stable_mosaic.version = 11 : i64} {
  func.func @_skip_linear_kernel(%arg0: i32, %arg1: memref<32x128xf32, #tpu.memory_space<vmem>>, %arg2: memref<128x128xf32, #tpu.memory_space<vmem>>, %arg3: memref<1x128xf32, #tpu.memory_space<vmem>>, %arg4: memref<32x128xf32, #tpu.memory_space<vmem>>) attributes {dimension_semantics = [#tpu.dimension_semantics<parallel>], iteration_bounds = array<i64: 4>, scalar_prefetch = 0 : i64, scratch_operands = 0 : i64, tpu.core_type = #tpu.core_type<tc>, window_params = [{transform_indices = @transform_0, window_bounds = array<i64: 32, 128>}, {pipeline_mode = #tpu.pipeline_mode<synchronous>, transform_indices = @transform_1, window_bounds = array<i64: 128, 128>}, {pipeline_mode = #tpu.pipeline_mode<synchronous>, transform_indices = @transform_2, window_bounds = array<i64: 1, 128>}, {transform_indices = @transform_3, window_bounds = array<i64: 32, 128>}]} {
    %c0 = arith.constant 0 : index
    %c0_0 = arith.constant 0 : index
    %0 = vector.load %arg1[%c0, %c0_0] : memref<32x128xf32, #tpu.memory_space<vmem>>, vector<32x128xf32>
    %c0_1 = arith.constant 0 : index
    %c0_2 = arith.constant 0 : index
    %1 = vector.load %arg2[%c0_1, %c0_2] : memref<128x128xf32, #tpu.memory_space<vmem>>, vector<128x128xf32>
    %cst = arith.constant dense<0.000000e+00> : vector<32x128xf32>
    %2 = tpu.matmul %0, %1, %cst {dimension_numbers = #tpu.dot_dimension_numbers<[1], [0], [0], [1], [0, 0, 1, 1], [], []>} : vector<32x128xf32>, vector<128x128xf32>, vector<32x128xf32> -> vector<32x128xf32>
    %c0_3 = arith.constant 0 : index
    %c0_4 = arith.constant 0 : index
    %3 = vector.load %arg3[%c0_3, %c0_4] : memref<1x128xf32, #tpu.memory_space<vmem>>, vector<1x128xf32>
    %4 = vector.broadcast %3 : vector<1x128xf32> to vector<32x128xf32>
    %5 = arith.addf %2, %4 : vector<32x128xf32>
    %6 = arith.addf %0, %5 : vector<32x128xf32>
    %c0_5 = arith.constant 0 : index
    %c0_6 = arith.constant 0 : index
    %7 = vector.load %arg4[%c0_5, %c0_6] : memref<32x128xf32, #tpu.memory_space<vmem>>, vector<32x128xf32>
    tpu.vector_store %arg4[%c0_5, %c0_6], %6 {strides = array<i32>} : memref<32x128xf32, #tpu.memory_space<vmem>>, vector<32x128xf32>,
    return
  }
  func.func @transform_0(%arg0: i32) -> (i32, i32) {
    %c0_i32 = arith.constant 0 : i32
    %c0_i32_0 = arith.constant 0 : i32
    return %arg0, %c0_i32 : i32, i32
  }
  func.func @transform_1(%arg0: i32) -> (i32, i32) {
    %c0_i32 = arith.constant 0 : i32
    %c0_i32_0 = arith.constant 0 : i32
    %c0_i32_1 = arith.constant 0 : i32
    return %c0_i32, %c0_i32_0 : i32, i32
  }
  func.func @transform_2(%arg0: i32) -> (i32, i32) {
    %c0_i32 = arith.constant 0 : i32
    %c0_i32_0 = arith.constant 0 : i32
    %c0_i32_1 = arith.constant 0 : i32
    return %c0_i32, %c0_i32_0 : i32, i32
  }
  func.func @transform_3(%arg0: i32) -> (i32, i32) {
    %c0_i32 = arith.constant 0 : i32
    %c0_i32_0 = arith.constant 0 : i32
    return %arg0, %c0_i32 : i32, i32
  }
}

</mosaic_0001>

<bundles_post_ra>
// kernel: skip_connection_linear.1
= control target key start
LH: loop header
LB: loop body
LE: loop exit
PB: predicated region body
PF: predicated region fallthrough
CT: control target
= control target key end

     0   :  { %s488_s12 = smov 0   ;;  %s565_s0 = inlined_call_operand.vmem [shape: f32[128,128], index: 0, kind: input, shape index: {}, may-alias: {0,3}]   ;;  %s566_s1 = inlined_call_operand.vmem [shape: f32[128,128], index: 1, kind: input, shape index: {}]   ;;  %s567_s2 = inlined_call_operand.vmem [shape: f32[1,128], index: 2, kind: input, shape index: {}]   ;;  %s568_s3 = inlined_call_operand.vmem [shape: f32[128,128], index: 3, kind: output, shape index: {}, may-alias: {0,3}]  }
   0x1 LB: > { %s350_s13 = sadd.s32 4294967295, %s466_s12   ;;  %p354_p0 = scmp.ge.s32.totalorder %s466_s12, 1  ;;  %s466_s12 = sphi %s488_s12, %s13_s12  }
   0x2   : > { %p138_p1 = scmp.lt.s32.totalorder %s466_s12, 5 }
   0x4   : > { %p139_p2 = pnand %p354_p0, %p138_p1 }
   0x5   : > { %s355_s30 = sshll.u32 (!%p139_p2), %s350_s13, 2 }
   0x6   : > { %142 = sbr.rel (%p139_p2) target bundleno = 245 (0xf5), region = 32  ;;  %p163_p3 = scmp.lt.s32.totalorder (!%p139_p2), %s355_s30, 15 }
   0xb   : > { %v193_v0 = vld [vmem:[%s566_s1 + $0x78] sm:$0xff]  ;;  %v192_v1 = vld [vmem:[%s566_s1 + $0x70] sm:$0xff]  ;;  %v191_v2 = vld [vmem:[%s566_s1 + $0x68] sm:$0xff]  ;;  %s570_s30 = smov (!%p163_p3, %s355_s30), 15 }
   0xc   : > { %382 = vmatprep.subr.mxu0 %v193_v0  ;;  %420 = vmatprep.subr.mxu1 %v193_v0  ;;  %v190_v3 = vld [vmem:[%s566_s1 + $0x60] sm:$0xff]  ;;  %v189_v4 = vld [vmem:[%s566_s1 + $0x58] sm:$0xff]  ;;  %v188_v5 = vld [vmem:[%s566_s1 + $0x50] sm:$0xff]  ;;  %s356_s17 = sshll.u32 %s570_s30, 3 }
   0xd   : > { %383 = vmatpush3.msra.mxu0 %v193_v0  ;;  %436 = vmatpush3.msra.mxu1 %v193_v0  ;;  %v187_v6 = vld [vmem:[%s566_s1 + $0x48] sm:$0xff]  ;;  %v186_v7 = vld [vmem:[%s566_s1 + $0x40] sm:$0xff]  ;;  %v185_v8 = vld [vmem:[%s566_s1 + $0x38] sm:$0xff]  ;;  %s166_s22 = scalar_lea.vmem %s565_s0, %s356_s17  ;;  %s172_s29 = scalar_lea.vmem %s568_s3, %s356_s17 }
   0xe   : > { %384 = vmatprep.subr.mxu0 %v192_v1  ;;  %421 = vmatprep.subr.mxu1 %v192_v1  ;;  %v184_v9 = vld [vmem:[%s566_s1 + $0x30] sm:$0xff]  ;;  %v183_v10 = vld [vmem:[%s566_s1 + $0x28] sm:$0xff]  ;;  %v182_v11 = vld [vmem:[%s566_s1 + $0x20] sm:$0xff] }
   0xf   : > { %385 = vmatpush3.msra.mxu0 %v192_v1  ;;  %437 = vmatpush3.msra.mxu1 %v192_v1  ;;  %v181_v12 = vld [vmem:[%s566_s1 + $0x18] sm:$0xff]  ;;  %v180_v13 = vld [vmem:[%s566_s1 + $0x10] sm:$0xff]  ;;  %v179_v14 = vld [vmem:[%s566_s1 + $0x8] sm:$0xff] }
  0x10   : > { %386 = vmatprep.subr.mxu0 %v191_v2  ;;  %422 = vmatprep.subr.mxu1 %v191_v2  ;;  %v178_v15 = vld [vmem:[%s566_s1] sm:$0xff]  ;;  %v176_v17 = vld [vmem:[%s166_s22 + $0x10] sm:$0xff]  ;;  %v175_v18 = vld [vmem:[%s166_s22 + $0x8] sm:$0xff] }
  0x11   : > { %387 = vmatpush3.msra.mxu0 %v191_v2  ;;  %438 = vmatpush3.msra.mxu1 %v191_v2  ;;  %v174_v16 = vld [vmem:[%s166_s22] sm:$0xff]  ;;  %v177_v19 = vld [vmem:[%s166_s22 + $0x18] sm:$0xff] }
  0x12   : > { %388 = vmatprep.subr.mxu0 %v190_v3  ;;  %423 = vmatprep.subr.mxu1 %v190_v3  ;;  %v359_v20 = vld [vmem:[%s567_s2] ss:$0 sm:$0xff] }
  0x13   : > { %389 = vmatpush3.msra.mxu0 %v190_v3  ;;  %439 = vmatpush3.msra.mxu1 %v190_v3 }
  0x14   : > { %390 = vmatprep.subr.mxu0 %v189_v4  ;;  %424 = vmatprep.subr.mxu1 %v189_v4 }
  0x15   : > { %391 = vmatpush3.msra.mxu0 %v189_v4  ;;  %440 = vmatpush3.msra.mxu1 %v189_v4 }
  0x16   : > { %392 = vmatprep.subr.mxu0 %v188_v5  ;;  %425 = vmatprep.subr.mxu1 %v188_v5 }
  0x17   : > { %393 = vmatpush3.msra.mxu0 %v188_v5  ;;  %441 = vmatpush3.msra.mxu1 %v188_v5 }
  0x18   : > { %394 = vmatprep.subr.mxu0 %v187_v6  ;;  %426 = vmatprep.subr.mxu1 %v187_v6 }
  0x19   : > { %395 = vmatpush3.msra.mxu0 %v187_v6  ;;  %442 = vmatpush3.msra.mxu1 %v187_v6 }
  0x1a   : > { %396 = vmatprep.subr.mxu0 %v186_v7  ;;  %427 = vmatprep.subr.mxu1 %v186_v7 }
  0x1b   : > { %397 = vmatpush3.msra.mxu0 %v186_v7  ;;  %443 = vmatpush3.msra.mxu1 %v186_v7 }
  0x1c   : > { %398 = vmatprep.subr.mxu0 %v185_v8  ;;  %428 = vmatprep.subr.mxu1 %v185_v8 }
  0x1d   : > { %399 = vmatpush3.msra.mxu0 %v185_v8  ;;  %444 = vmatpush3.msra.mxu1 %v185_v8 }
  0x1e   : > { %400 = vmatprep.subr.mxu0 %v184_v9  ;;  %429 = vmatprep.subr.mxu1 %v184_v9 }
  0x1f   : > { %401 = vmatpush3.msra.mxu0 %v184_v9  ;;  %445 = vmatpush3.msra.mxu1 %v184_v9 }
  0x20   : > { %402 = vmatprep.subr.mxu0 %v183_v10  ;;  %430 = vmatprep.subr.mxu1 %v183_v10 }
  0x21   : > { %403 = vmatpush3.msra.mxu0 %v183_v10  ;;  %446 = vmatpush3.msra.mxu1 %v183_v10 }
  0x22   : > { %404 = vmatprep.subr.mxu0 %v182_v11  ;;  %431 = vmatprep.subr.mxu1 %v182_v11 }
  0x23   : > { %405 = vmatpush3.msra.mxu0 %v182_v11  ;;  %447 = vmatpush3.msra.mxu1 %v182_v11 }
  0x24   : > { %406 = vmatprep.subr.mxu0 %v181_v12  ;;  %432 = vmatprep.subr.mxu1 %v181_v12 }
  0x25   : > { %407 = vmatpush3.msra.mxu0 %v181_v12  ;;  %448 = vmatpush3.msra.mxu1 %v181_v12 }
  0x26   : > { %408 = vmatprep.subr.mxu0 %v180_v13  ;;  %433 = vmatprep.subr.mxu1 %v180_v13 }
  0x27   : > { %409 = vmatpush3.msra.mxu0 %v180_v13  ;;  %449 = vmatpush3.msra.mxu1 %v180_v13 }
  0x28   : > { %410 = vmatprep.subr.mxu0 %v179_v14  ;;  %434 = vmatprep.subr.mxu1 %v179_v14 }
  0x29   : > { %411 = vmatpush3.msra.mxu0 %v179_v14  ;;  %450 = vmatpush3.msra.mxu1 %v179_v14 }
  0x2a   : > { %412 = vmatprep.subr.mxu0 %v178_v15  ;;  %435 = vmatprep.subr.mxu1 %v178_v15 }
  0x2b   : > { %413 = vmatpush3.msra.mxu0 %v178_v15  ;;  %451 = vmatpush3.msra.mxu1 %v178_v15 }
  0x2c   : > { %414 = vmatprep.mubr.f32.mxu0 %v174_v16  ;;  %417 = vmatprep.mubr.f32.mxu1 %v176_v17 }
  0x2d   : > { %415 = vmatmul.mubr.f32.vlgmr.msra.gmra.mxu0 %v175_v18  ;;  %418 = vmatmul.mubr.f32.vlgmr.msra.gmra.mxu1 %v177_v19 }
  0xed   : > { %v416_v21 = vpop.f32.mrf.mxu0  ;;  %v419_v22 = vpop.f32.mrf.mxu1 }
  0xee   : > { %v273_v23 = vadd.f32 %v416_v21, %v359_v20  ;;  %v283_v24 = vadd.f32 %v419_v22, %v359_v20 }
  0xef   : > { %v267_v25 = vpop.f32.mrf.mxu0  ;;  %v277_v26 = vpop.f32.mrf.mxu1 }
  0xf0   : > { %v287_v27 = vadd.f32 %v273_v23, %v175_v18  ;;  %v289_v28 = vadd.f32 %v283_v24, %v177_v19  ;;  %v268_v29 = vadd.f32 %v359_v20, %v267_v25  ;;  %v278_v30 = vadd.f32 %v359_v20, %v277_v26 }
  0xf2   : > { %291 = vst [vmem:[%s172_s29 + $0x8] sm:$0xff] %v287_v27  ;;  %293 = vst [vmem:[%s172_s29 + $0x18] sm:$0xff] %v289_v28  ;;  %v286_v31 = vadd.f32 %v268_v29, %v174_v16  ;;  %v288_v32 = vadd.f32 %v278_v30, %v176_v17 }
  0xf4   : > { %290 = vst [vmem:[%s172_s29] sm:$0xff] %v286_v31  ;;  %292 = vst [vmem:[%s172_s29 + $0x10] sm:$0xff] %v288_v32 }
  0xf5 PF: > { %s13_s12 = sadd.s32 1, %s466_s12  }
  0xf6   : > { %p10_p4 = scmp.ge.s32.totalorder %s13_s12, 6  }
  0xf8   :  { %12 = sbr.rel (!%p10_p4) target bundleno = 1 (0x1), region = 62 }

</bundles_post_ra>
